<compile_context>
chip_gen: v7x
topology: tpu7x:2x2x1
jax: 0.10.0
libtpu: 0.0.40
codegen_flags: <defaults>
</compile_context>

<pallas_src>
import functools

import jax
import jax.numpy as jnp
import numpy as np
from jax.experimental import pallas as pl
from jax.experimental.pallas import tpu as pltpu


def _resblock_kernel(x_ref, masks_ref, w1_ref, g1_ref, b1_ref,
                     w2_ref, g2_ref, b2_ref, out_ref, patch_ref,
                     *, W, HW, HWp):
    """One grid step = one sample, lane-flattened (Cp, HWp) layout.

    x_ref     : (1, Cp, HWp)  input sample (channels padded to mult of 8,
                              spatial flattened + lane-padded to mult of 128)
    masks_ref : (9, 1, HWp)   f32 {0,1} masks, tap-major; zero at out-of-image
                              taps AND at pad lanes (all 9 taps masked)
    w*_ref    : (3, Cp, 3*Cp) bf16 weights, w[ky, co, kx*Cp+ci] = w[co,ci,ky,kx]
    g*/b*     : (Cp, 1)       f32 InstanceNorm affine params
    out_ref   : (1, Cp, HWp)  f32 output
    patch_ref : (2, 3*Cp, HWp) bf16 double-buffered im2col chunk scratch
    """
    Cp = out_ref.shape[1]
    eps = 1e-5
    inv_hw = 1.0 / HW

    def conv3x3(h, w_ref):
        # 3 accumulated K-chunks (one per kernel row dy).  Each chunk builds
        # 3*Cp im2col rows via static lane rolls (XLU) + boundary masks (VPU),
        # stored bf16, then one (Cp, 3*Cp) @ (3*Cp, HWp) MXU matmul with f32
        # accumulation.  Two scratch slots remove the WAR hazard so chunk c+1's
        # halo build overlaps chunk c's matmul.
        acc = None
        for c, dy in enumerate((-1, 0, 1)):
            slot = c % 2
            for j, dx in enumerate((-1, 0, 1)):
                t = 3 * c + j
                shift = (-(dy * W + dx)) % HWp   # rolled[f] = h[f + dy*W + dx]
                piece = h if shift == 0 else pltpu.roll(h, shift=shift, axis=1)
                piece = piece * masks_ref[t]     # zero out-of-image / pad lanes
                patch_ref[slot, j * Cp:(j + 1) * Cp, :] = piece.astype(
                    patch_ref.dtype)
            part = jnp.dot(w_ref[c], patch_ref[slot],
                           preferred_element_type=jnp.float32)
            acc = part if acc is None else acc + part
        return acc                                # (Cp, HWp) f32

    def inorm(h, g_ref, b_ref):
        # Per-channel spatial stats in f32, single pass.  Pad lanes of h are
        # exact zeros (masked conv output), so sums over HWp lanes equal sums
        # over the true HW; divide by HW, not HWp.
        s1 = jnp.sum(h, axis=1, keepdims=True)
        s2 = jnp.sum(h * h, axis=1, keepdims=True)
        mean = s1 * inv_hw
        var = jnp.maximum(s2 * inv_hw - mean * mean, 0.0)
        scale = jax.lax.rsqrt(var + eps) * g_ref[...]
        return (h - mean) * scale + b_ref[...]

    x = x_ref[0]                                              # (Cp, HWp) f32
    h1 = jnp.maximum(inorm(conv3x3(x, w1_ref), g1_ref, b1_ref), 0.0)
    h2 = inorm(conv3x3(h1, w2_ref), g2_ref, b2_ref)
    out_ref[0] = x + h2                                       # residual add


@jax.jit
def residual_block(x, w1, g1, b1, w2, g2, b2):
    """x: (B, C, H, W) f32; conv weights (C, C, 3, 3); IN params (C,)."""
    B, C, H, W = x.shape
    HW = H * W
    Cp = -(-C // 8) * 8            # channels -> sublane multiple of 8
    HWp = -(-HW // 128) * 128      # flat spatial -> lane multiple of 128

    x = x.astype(jnp.float32)
    xf = x.reshape(B, C, HW)
    if Cp != C or HWp != HW:
        xf = jnp.pad(xf, ((0, 0), (0, Cp - C), (0, HWp - HW)))

    def prep_w(w):
        w = w.astype(jnp.float32)
        if Cp != C:
            w = jnp.pad(w, ((0, Cp - C), (0, Cp - C), (0, 0), (0, 0)))
        # w3[ky, co, kx*Cp + ci] = w[co, ci, ky, kx]; bf16 feeds the MXU.
        w3 = jnp.transpose(w, (2, 0, 3, 1)).reshape(3, Cp, 3 * Cp)
        return w3.astype(jnp.bfloat16)

    def prep_v(v):
        v = v.astype(jnp.float32)
        if Cp != C:
            v = jnp.pad(v, ((0, Cp - C),))
        return v.reshape(Cp, 1)

    w1t, w2t = prep_w(w1), prep_w(w2)
    g1c, b1c = prep_v(g1), prep_v(b1)
    g2c, b2c = prep_v(g2), prep_v(b2)

    # Tap-major boundary masks (trace-time constants): masks[t, 0, y*W+x] = 1
    # iff (y+dy, x+dx) is inside the image, t = (dy+1)*3 + (dx+1); pad lanes
    # (flat index >= HW) are 0 for every tap, including the center tap.
    masks_np = np.zeros((9, 1, HWp), np.float32)
    yy, xx = np.meshgrid(np.arange(H), np.arange(W), indexing="ij")
    t = 0
    for dy in (-1, 0, 1):
        for dx in (-1, 0, 1):
            ok = ((yy + dy >= 0) & (yy + dy < H) &
                  (xx + dx >= 0) & (xx + dx < W))
            masks_np[t, 0, :HW] = ok.reshape(HW).astype(np.float32)
            t += 1
    masks = jnp.asarray(masks_np)

    kernel = functools.partial(_resblock_kernel, W=W, HW=HW, HWp=HWp)

    # Rough VMEM budget (double-buffered x/out blocks, resident invariants,
    # bf16 patch double buffer, headroom for live f32 temps); generous margin.
    est = (2 * 2 * Cp * HWp * 4          # x & out pipelined blocks
           + 9 * HWp * 4                 # masks
           + 2 * 3 * Cp * 3 * Cp * 2     # weights (bf16)
           + 4 * Cp * 128 * 4            # affine params (lane padded)
           + 2 * 3 * Cp * HWp * 2        # patch double buffer (bf16)
           + 6 * Cp * HWp * 4)           # live f32 temps headroom
    vmem_limit = int(min(max(2 * est, 32 * 1024 * 1024), 64 * 1024 * 1024))

    invariant = pl.BlockSpec(memory_space=pltpu.MemorySpace.VMEM)

    out_flat = pl.pallas_call(
        kernel,
        out_shape=jax.ShapeDtypeStruct((B, Cp, HWp), jnp.float32),
        grid_spec=pltpu.PrefetchScalarGridSpec(
            num_scalar_prefetch=0,
            grid=(B,),
            in_specs=[
                pl.BlockSpec((1, Cp, HWp), lambda b: (b, 0, 0)),  # x (pipelined)
                invariant,                                        # masks
                invariant,                                        # w1
                invariant,                                        # g1
                invariant,                                        # b1
                invariant,                                        # w2
                invariant,                                        # g2
                invariant,                                        # b2
            ],
            out_specs=pl.BlockSpec((1, Cp, HWp), lambda b: (b, 0, 0)),
            scratch_shapes=[pltpu.VMEM((2, 3 * Cp, HWp), jnp.bfloat16)],
        ),
        compiler_params=pltpu.CompilerParams(
            dimension_semantics=("parallel",),
            vmem_limit_bytes=vmem_limit),
    )(xf, masks, w1t, g1c, b1c, w2t, g2c, b2c)

    out = out_flat[:, :C, :HW]
    return out.reshape(B, C, H, W)


def _reference(x, w1, g1, b1, w2, g2, b2):
    """Pure-JAX reference of the PyTorch forward (training-mode InstanceNorm).

    Convolutions use bf16 inputs with f32 accumulation to mirror the kernel's
    MXU precision (the kernel keeps all InstanceNorm math in f32)."""
    dn = ("NCHW", "OIHW", "NCHW")

    def conv(h, w):
        return jax.lax.conv_general_dilated(
            h.astype(jnp.bfloat16), w.astype(jnp.bfloat16), (1, 1), "SAME",
            dimension_numbers=dn, preferred_element_type=jnp.float32)

    def inorm(h, g, b):
        mean = h.mean(axis=(2, 3), keepdims=True)
        var = ((h - mean) ** 2).mean(axis=(2, 3), keepdims=True)
        hn = (h - mean) / jnp.sqrt(var + 1e-5)
        return hn * g.reshape(1, -1, 1, 1) + b.reshape(1, -1, 1, 1)

    h = conv(x, w1)
    h = inorm(h, g1, b1)
    h = jnp.maximum(h, 0.0)
    h = conv(h, w2)
    h = inorm(h, g2, b2)
    return x + h


if __name__ == "__main__":
    B, C, H, W = 2, 4, 16, 16   # dim_in == dim_out == C (required by residual add)

    key = jax.random.PRNGKey(0)
    kx, k1, k2, k3, k4 = jax.random.split(key, 5)

    x = jax.random.normal(kx, (B, C, H, W), dtype=jnp.float32)
    # deterministic synthetic parameters (shapes match nn.Conv2d / InstanceNorm2d)
    w1 = jax.random.normal(k1, (C, C, 3, 3), dtype=jnp.float32) * 0.1
    w2 = jax.random.normal(k2, (C, C, 3, 3), dtype=jnp.float32) * 0.1
    g1 = 1.0 + 0.1 * jax.random.normal(k3, (C,), dtype=jnp.float32)
    b1 = 0.1 * jax.random.normal(k4, (C,), dtype=jnp.float32)
    g2 = jnp.ones((C,), dtype=jnp.float32)
    b2 = jnp.zeros((C,), dtype=jnp.float32)

    out = residual_block(x, w1, g1, b1, w2, g2, b2)
    out = jax.block_until_ready(out)

    ref = _reference(x, w1, g1, b1, w2, g2, b2)
    assert out.shape == (B, C, H, W)
    assert jnp.allclose(out, ref, rtol=1e-2, atol=1e-2), (
        float(jnp.max(jnp.abs(out - ref))))

    print("KERNEL_OK")
</pallas_src>

<mosaic_0001>
module attributes {stable_mosaic.version = 11 : i64} {
  func.func @_resblock_kernel(%arg0: i32, %arg1: memref<1x8x256xf32, #tpu.memory_space<vmem>>, %arg2: memref<9x1x256xf32, #tpu.memory_space<vmem>>, %arg3: memref<3x8x24xbf16, #tpu.memory_space<vmem>>, %arg4: memref<8x1xf32, #tpu.memory_space<vmem>>, %arg5: memref<8x1xf32, #tpu.memory_space<vmem>>, %arg6: memref<3x8x24xbf16, #tpu.memory_space<vmem>>, %arg7: memref<8x1xf32, #tpu.memory_space<vmem>>, %arg8: memref<8x1xf32, #tpu.memory_space<vmem>>, %arg9: memref<1x8x256xf32, #tpu.memory_space<vmem>>, %arg10: memref<2x24x256xbf16, #tpu.memory_space<vmem>>) attributes {dimension_semantics = [#tpu.dimension_semantics<parallel>], iteration_bounds = array<i64: 2>, scalar_prefetch = 0 : i64, scratch_operands = 1 : i64, tpu.core_type = #tpu.core_type<tc>, window_params = [{transform_indices = @transform_0, window_bounds = array<i64: 1, 8, 256>}, {pipeline_mode = #tpu.pipeline_mode<synchronous>, transform_indices = @transform_1, window_bounds = array<i64: 9, 1, 256>}, {pipeline_mode = #tpu.pipeline_mode<synchronous>, transform_indices = @transform_2, window_bounds = array<i64: 3, 8, 24>}, {pipeline_mode = #tpu.pipeline_mode<synchronous>, transform_indices = @transform_3, window_bounds = array<i64: 8, 1>}, {pipeline_mode = #tpu.pipeline_mode<synchronous>, transform_indices = @transform_4, window_bounds = array<i64: 8, 1>}, {pipeline_mode = #tpu.pipeline_mode<synchronous>, transform_indices = @transform_5, window_bounds = array<i64: 3, 8, 24>}, {pipeline_mode = #tpu.pipeline_mode<synchronous>, transform_indices = @transform_6, window_bounds = array<i64: 8, 1>}, {pipeline_mode = #tpu.pipeline_mode<synchronous>, transform_indices = @transform_7, window_bounds = array<i64: 8, 1>}, {transform_indices = @transform_8, window_bounds = array<i64: 1, 8, 256>}]} {
    %c0 = arith.constant 0 : index
    %c0_0 = arith.constant 0 : index
    %c0_1 = arith.constant 0 : index
    %0 = vector.load %arg1[%c0, %c0_0, %c0_1] : memref<1x8x256xf32, #tpu.memory_space<vmem>>, vector<1x8x256xf32>
    %1 = vector.shape_cast %0 : vector<1x8x256xf32> to vector<8x256xf32>
    %c17_i32 = arith.constant 17 : i32
    %2 = tpu.dynamic_rotate %1 by %c17_i32 dim 1 : vector<8x256xf32>, i32 -> vector<8x256xf32>
    %c0_2 = arith.constant 0 : index
    %c0_3 = arith.constant 0 : index
    %c0_4 = arith.constant 0 : index
    %3 = vector.load %arg2[%c0_2, %c0_3, %c0_4] : memref<9x1x256xf32, #tpu.memory_space<vmem>>, vector<1x1x256xf32>
    %4 = vector.shape_cast %3 : vector<1x1x256xf32> to vector<1x256xf32>
    %5 = vector.broadcast %4 : vector<1x256xf32> to vector<8x256xf32>
    %6 = arith.mulf %2, %5 : vector<8x256xf32>
    %7 = arith.truncf %6 : vector<8x256xf32> to vector<8x256xbf16>
    %c0_5 = arith.constant 0 : index
    %c0_6 = arith.constant 0 : index
    %c0_7 = arith.constant 0 : index
    %8 = vector.load %arg10[%c0_5, %c0_6, %c0_7] : memref<2x24x256xbf16, #tpu.memory_space<vmem>>, vector<1x8x256xbf16>
    %9 = vector.shape_cast %8 : vector<1x8x256xbf16> to vector<8x256xbf16>
    %10 = vector.shape_cast %7 : vector<8x256xbf16> to vector<1x8x256xbf16>
    tpu.vector_store %arg10[%c0_5, %c0_6, %c0_7], %10 {strides = array<i32>} : memref<2x24x256xbf16, #tpu.memory_space<vmem>>, vector<1x8x256xbf16>,
    %c16_i32 = arith.constant 16 : i32
    %11 = tpu.dynamic_rotate %1 by %c16_i32 dim 1 : vector<8x256xf32>, i32 -> vector<8x256xf32>
    %c1 = arith.constant 1 : index
    %c0_8 = arith.constant 0 : index
    %c0_9 = arith.constant 0 : index
    %12 = vector.load %arg2[%c1, %c0_8, %c0_9] : memref<9x1x256xf32, #tpu.memory_space<vmem>>, vector<1x1x256xf32>
    %13 = vector.shape_cast %12 : vector<1x1x256xf32> to vector<1x256xf32>
    %14 = vector.broadcast %13 : vector<1x256xf32> to vector<8x256xf32>
    %15 = arith.mulf %11, %14 : vector<8x256xf32>
    %16 = arith.truncf %15 : vector<8x256xf32> to vector<8x256xbf16>
    %c0_10 = arith.constant 0 : index
    %c8 = arith.constant 8 : index
    %c0_11 = arith.constant 0 : index
    %17 = vector.load %arg10[%c0_10, %c8, %c0_11] : memref<2x24x256xbf16, #tpu.memory_space<vmem>>, vector<1x8x256xbf16>
    %18 = vector.shape_cast %17 : vector<1x8x256xbf16> to vector<8x256xbf16>
    %19 = vector.shape_cast %16 : vector<8x256xbf16> to vector<1x8x256xbf16>
    tpu.vector_store %arg10[%c0_10, %c8, %c0_11], %19 {strides = array<i32>} : memref<2x24x256xbf16, #tpu.memory_space<vmem>>, vector<1x8x256xbf16>,
    %c15_i32 = arith.constant 15 : i32
    %20 = tpu.dynamic_rotate %1 by %c15_i32 dim 1 : vector<8x256xf32>, i32 -> vector<8x256xf32>
    %c2 = arith.constant 2 : index
    %c0_12 = arith.constant 0 : index
    %c0_13 = arith.constant 0 : index
    %21 = vector.load %arg2[%c2, %c0_12, %c0_13] : memref<9x1x256xf32, #tpu.memory_space<vmem>>, vector<1x1x256xf32>
    %22 = vector.shape_cast %21 : vector<1x1x256xf32> to vector<1x256xf32>
    %23 = vector.broadcast %22 : vector<1x256xf32> to vector<8x256xf32>
    %24 = arith.mulf %20, %23 : vector<8x256xf32>
    %25 = arith.truncf %24 : vector<8x256xf32> to vector<8x256xbf16>
    %c0_14 = arith.constant 0 : index
    %c16 = arith.constant 16 : index
    %c0_15 = arith.constant 0 : index
    %26 = vector.load %arg10[%c0_14, %c16, %c0_15] : memref<2x24x256xbf16, #tpu.memory_space<vmem>>, vector<1x8x256xbf16>
    %27 = vector.shape_cast %26 : vector<1x8x256xbf16> to vector<8x256xbf16>
    %28 = vector.shape_cast %25 : vector<8x256xbf16> to vector<1x8x256xbf16>
    tpu.vector_store %arg10[%c0_14, %c16, %c0_15], %28 {strides = array<i32>} : memref<2x24x256xbf16, #tpu.memory_space<vmem>>, vector<1x8x256xbf16>,
    %c0_16 = arith.constant 0 : index
    %c0_17 = arith.constant 0 : index
    %c0_18 = arith.constant 0 : index
    %29 = vector.load %arg3[%c0_16, %c0_17, %c0_18] : memref<3x8x24xbf16, #tpu.memory_space<vmem>>, vector<1x8x24xbf16>
    %30 = vector.shape_cast %29 : vector<1x8x24xbf16> to vector<8x24xbf16>
    %c0_19 = arith.constant 0 : index
    %c0_20 = arith.constant 0 : index
    %c0_21 = arith.constant 0 : index
    %31 = vector.load %arg10[%c0_19, %c0_20, %c0_21] : memref<2x24x256xbf16, #tpu.memory_space<vmem>>, vector<1x24x256xbf16>
    %32 = vector.shape_cast %31 : vector<1x24x256xbf16> to vector<24x256xbf16>
    %cst = arith.constant dense<0.000000e+00> : vector<8x256xf32>
    %33 = tpu.matmul %30, %32, %cst {dimension_numbers = #tpu.dot_dimension_numbers<[1], [0], [0], [1], [0, 0, 1, 1], [], []>} : vector<8x24xbf16>, vector<24x256xbf16>, vector<8x256xf32> -> vector<8x256xf32>
    %c1_i32 = arith.constant 1 : i32
    %34 = tpu.dynamic_rotate %1 by %c1_i32 dim 1 : vector<8x256xf32>, i32 -> vector<8x256xf32>
    %c3 = arith.constant 3 : index
    %c0_22 = arith.constant 0 : index
    %c0_23 = arith.constant 0 : index
    %35 = vector.load %arg2[%c3, %c0_22, %c0_23] : memref<9x1x256xf32, #tpu.memory_space<vmem>>, vector<1x1x256xf32>
    %36 = vector.shape_cast %35 : vector<1x1x256xf32> to vector<1x256xf32>
    %37 = vector.broadcast %36 : vector<1x256xf32> to vector<8x256xf32>
    %38 = arith.mulf %34, %37 : vector<8x256xf32>
    %39 = arith.truncf %38 : vector<8x256xf32> to vector<8x256xbf16>
    %c1_24 = arith.constant 1 : index
    %c0_25 = arith.constant 0 : index
    %c0_26 = arith.constant 0 : index
    %40 = vector.load %arg10[%c1_24, %c0_25, %c0_26] : memref<2x24x256xbf16, #tpu.memory_space<vmem>>, vector<1x8x256xbf16>
    %41 = vector.shape_cast %40 : vector<1x8x256xbf16> to vector<8x256xbf16>
    %42 = vector.shape_cast %39 : vector<8x256xbf16> to vector<1x8x256xbf16>
    tpu.vector_store %arg10[%c1_24, %c0_25, %c0_26], %42 {strides = array<i32>} : memref<2x24x256xbf16, #tpu.memory_space<vmem>>, vector<1x8x256xbf16>,
    %c4 = arith.constant 4 : index
    %c0_27 = arith.constant 0 : index
    %c0_28 = arith.constant 0 : index
    %43 = vector.load %arg2[%c4, %c0_27, %c0_28] : memref<9x1x256xf32, #tpu.memory_space<vmem>>, vector<1x1x256xf32>
    %44 = vector.shape_cast %43 : vector<1x1x256xf32> to vector<1x256xf32>
    %45 = vector.broadcast %44 : vector<1x256xf32> to vector<8x256xf32>
    %46 = arith.mulf %1, %45 : vector<8x256xf32>
    %47 = arith.truncf %46 : vector<8x256xf32> to vector<8x256xbf16>
    %c1_29 = arith.constant 1 : index
    %c8_30 = arith.constant 8 : index
    %c0_31 = arith.constant 0 : index
    %48 = vector.load %arg10[%c1_29, %c8_30, %c0_31] : memref<2x24x256xbf16, #tpu.memory_space<vmem>>, vector<1x8x256xbf16>
    %49 = vector.shape_cast %48 : vector<1x8x256xbf16> to vector<8x256xbf16>
    %50 = vector.shape_cast %47 : vector<8x256xbf16> to vector<1x8x256xbf16>
    tpu.vector_store %arg10[%c1_29, %c8_30, %c0_31], %50 {strides = array<i32>} : memref<2x24x256xbf16, #tpu.memory_space<vmem>>, vector<1x8x256xbf16>,
    %c255_i32 = arith.constant 255 : i32
    %51 = tpu.dynamic_rotate %1 by %c255_i32 dim 1 : vector<8x256xf32>, i32 -> vector<8x256xf32>
    %c5 = arith.constant 5 : index
    %c0_32 = arith.constant 0 : index
    %c0_33 = arith.constant 0 : index
    %52 = vector.load %arg2[%c5, %c0_32, %c0_33] : memref<9x1x256xf32, #tpu.memory_space<vmem>>, vector<1x1x256xf32>
    %53 = vector.shape_cast %52 : vector<1x1x256xf32> to vector<1x256xf32>
    %54 = vector.broadcast %53 : vector<1x256xf32> to vector<8x256xf32>
    %55 = arith.mulf %51, %54 : vector<8x256xf32>
    %56 = arith.truncf %55 : vector<8x256xf32> to vector<8x256xbf16>
    %c1_34 = arith.constant 1 : index
    %c16_35 = arith.constant 16 : index
    %c0_36 = arith.constant 0 : index
    %57 = vector.load %arg10[%c1_34, %c16_35, %c0_36] : memref<2x24x256xbf16, #tpu.memory_space<vmem>>, vector<1x8x256xbf16>
    %58 = vector.shape_cast %57 : vector<1x8x256xbf16> to vector<8x256xbf16>
    %59 = vector.shape_cast %56 : vector<8x256xbf16> to vector<1x8x256xbf16>
    tpu.vector_store %arg10[%c1_34, %c16_35, %c0_36], %59 {strides = array<i32>} : memref<2x24x256xbf16, #tpu.memory_space<vmem>>, vector<1x8x256xbf16>,
    %c1_37 = arith.constant 1 : index
    %c0_38 = arith.constant 0 : index
    %c0_39 = arith.constant 0 : index
    %60 = vector.load %arg3[%c1_37, %c0_38, %c0_39] : memref<3x8x24xbf16, #tpu.memory_space<vmem>>, vector<1x8x24xbf16>
    %61 = vector.shape_cast %60 : vector<1x8x24xbf16> to vector<8x24xbf16>
    %c1_40 = arith.constant 1 : index
    %c0_41 = arith.constant 0 : index
    %c0_42 = arith.constant 0 : index
    %62 = vector.load %arg10[%c1_40, %c0_41, %c0_42] : memref<2x24x256xbf16, #tpu.memory_space<vmem>>, vector<1x24x256xbf16>
    %63 = vector.shape_cast %62 : vector<1x24x256xbf16> to vector<24x256xbf16>
    %cst_43 = arith.constant dense<0.000000e+00> : vector<8x256xf32>
    %64 = tpu.matmul %61, %63, %cst_43 {dimension_numbers = #tpu.dot_dimension_numbers<[1], [0], [0], [1], [0, 0, 1, 1], [], []>} : vector<8x24xbf16>, vector<24x256xbf16>, vector<8x256xf32> -> vector<8x256xf32>
    %65 = arith.addf %33, %64 : vector<8x256xf32>
    %c241_i32 = arith.constant 241 : i32
    %66 = tpu.dynamic_rotate %1 by %c241_i32 dim 1 : vector<8x256xf32>, i32 -> vector<8x256xf32>
    %c6 = arith.constant 6 : index
    %c0_44 = arith.constant 0 : index
    %c0_45 = arith.constant 0 : index
    %67 = vector.load %arg2[%c6, %c0_44, %c0_45] : memref<9x1x256xf32, #tpu.memory_space<vmem>>, vector<1x1x256xf32>
    %68 = vector.shape_cast %67 : vector<1x1x256xf32> to vector<1x256xf32>
    %69 = vector.broadcast %68 : vector<1x256xf32> to vector<8x256xf32>
    %70 = arith.mulf %66, %69 : vector<8x256xf32>
    %71 = arith.truncf %70 : vector<8x256xf32> to vector<8x256xbf16>
    %c0_46 = arith.constant 0 : index
    %c0_47 = arith.constant 0 : index
    %c0_48 = arith.constant 0 : index
    %72 = vector.load %arg10[%c0_46, %c0_47, %c0_48] : memref<2x24x256xbf16, #tpu.memory_space<vmem>>, vector<1x8x256xbf16>
    %73 = vector.shape_cast %72 : vector<1x8x256xbf16> to vector<8x256xbf16>
    %74 = vector.shape_cast %71 : vector<8x256xbf16> to vector<1x8x256xbf16>
    tpu.vector_store %arg10[%c0_46, %c0_47, %c0_48], %74 {strides = array<i32>} : memref<2x24x256xbf16, #tpu.memory_space<vmem>>, vector<1x8x256xbf16>,
    %c240_i32 = arith.constant 240 : i32
    %75 = tpu.dynamic_rotate %1 by %c240_i32 dim 1 : vector<8x256xf32>, i32 -> vector<8x256xf32>
    %c7 = arith.constant 7 : index
    %c0_49 = arith.constant 0 : index
    %c0_50 = arith.constant 0 : index
    %76 = vector.load %arg2[%c7, %c0_49, %c0_50] : memref<9x1x256xf32, #tpu.memory_space<vmem>>, vector<1x1x256xf32>
    %77 = vector.shape_cast %76 : vector<1x1x256xf32> to vector<1x256xf32>
    %78 = vector.broadcast %77 : vector<1x256xf32> to vector<8x256xf32>
    %79 = arith.mulf %75, %78 : vector<8x256xf32>
    %80 = arith.truncf %79 : vector<8x256xf32> to vector<8x256xbf16>
    %c0_51 = arith.constant 0 : index
    %c8_52 = arith.constant 8 : index
    %c0_53 = arith.constant 0 : index
    %81 = vector.load %arg10[%c0_51, %c8_52, %c0_53] : memref<2x24x256xbf16, #tpu.memory_space<vmem>>, vector<1x8x256xbf16>
    %82 = vector.shape_cast %81 : vector<1x8x256xbf16> to vector<8x256xbf16>
    %83 = vector.shape_cast %80 : vector<8x256xbf16> to vector<1x8x256xbf16>
    tpu.vector_store %arg10[%c0_51, %c8_52, %c0_53], %83 {strides = array<i32>} : memref<2x24x256xbf16, #tpu.memory_space<vmem>>, vector<1x8x256xbf16>,
    %c239_i32 = arith.constant 239 : i32
    %84 = tpu.dynamic_rotate %1 by %c239_i32 dim 1 : vector<8x256xf32>, i32 -> vector<8x256xf32>
    %c8_54 = arith.constant 8 : index
    %c0_55 = arith.constant 0 : index
    %c0_56 = arith.constant 0 : index
    %85 = vector.load %arg2[%c8_54, %c0_55, %c0_56] : memref<9x1x256xf32, #tpu.memory_space<vmem>>, vector<1x1x256xf32>
    %86 = vector.shape_cast %85 : vector<1x1x256xf32> to vector<1x256xf32>
    %87 = vector.broadcast %86 : vector<1x256xf32> to vector<8x256xf32>
    %88 = arith.mulf %84, %87 : vector<8x256xf32>
    %89 = arith.truncf %88 : vector<8x256xf32> to vector<8x256xbf16>
    %c0_57 = arith.constant 0 : index
    %c16_58 = arith.constant 16 : index
    %c0_59 = arith.constant 0 : index
    %90 = vector.load %arg10[%c0_57, %c16_58, %c0_59] : memref<2x24x256xbf16, #tpu.memory_space<vmem>>, vector<1x8x256xbf16>
    %91 = vector.shape_cast %90 : vector<1x8x256xbf16> to vector<8x256xbf16>
    %92 = vector.shape_cast %89 : vector<8x256xbf16> to vector<1x8x256xbf16>
    tpu.vector_store %arg10[%c0_57, %c16_58, %c0_59], %92 {strides = array<i32>} : memref<2x24x256xbf16, #tpu.memory_space<vmem>>, vector<1x8x256xbf16>,
    %c2_60 = arith.constant 2 : index
    %c0_61 = arith.constant 0 : index
    %c0_62 = arith.constant 0 : index
    %93 = vector.load %arg3[%c2_60, %c0_61, %c0_62] : memref<3x8x24xbf16, #tpu.memory_space<vmem>>, vector<1x8x24xbf16>
    %94 = vector.shape_cast %93 : vector<1x8x24xbf16> to vector<8x24xbf16>
    %c0_63 = arith.constant 0 : index
    %c0_64 = arith.constant 0 : index
    %c0_65 = arith.constant 0 : index
    %95 = vector.load %arg10[%c0_63, %c0_64, %c0_65] : memref<2x24x256xbf16, #tpu.memory_space<vmem>>, vector<1x24x256xbf16>
    %96 = vector.shape_cast %95 : vector<1x24x256xbf16> to vector<24x256xbf16>
    %cst_66 = arith.constant dense<0.000000e+00> : vector<8x256xf32>
    %97 = tpu.matmul %94, %96, %cst_66 {dimension_numbers = #tpu.dot_dimension_numbers<[1], [0], [0], [1], [0, 0, 1, 1], [], []>} : vector<8x24xbf16>, vector<24x256xbf16>, vector<8x256xf32> -> vector<8x256xf32>
    %98 = arith.addf %65, %97 : vector<8x256xf32>
    %cst_67 = arith.constant dense<0.000000e+00> : vector<8xf32>
    %99 = vector.multi_reduction <add>, %98, %cst_67 [1] : vector<8x256xf32> to vector<8xf32>
    %100 = vector.shape_cast %99 : vector<8xf32> to vector<8x1xf32>
    %101 = arith.mulf %98, %98 : vector<8x256xf32>
    %cst_68 = arith.constant dense<0.000000e+00> : vector<8xf32>
    %102 = vector.multi_reduction <add>, %101, %cst_68 [1] : vector<8x256xf32> to vector<8xf32>
    %103 = vector.shape_cast %102 : vector<8xf32> to vector<8x1xf32>
    %cst_69 = arith.constant 3.906250e-03 : f32
    %104 = vector.broadcast %cst_69 : f32 to vector<8x1xf32>
    %105 = arith.mulf %100, %104 : vector<8x1xf32>
    %cst_70 = arith.constant 3.906250e-03 : f32
    %106 = vector.broadcast %cst_70 : f32 to vector<8x1xf32>
    %107 = arith.mulf %103, %106 : vector<8x1xf32>
    %108 = arith.mulf %105, %105 : vector<8x1xf32>
    %109 = arith.subf %107, %108 : vector<8x1xf32>
    %cst_71 = arith.constant 0.000000e+00 : f32
    %110 = vector.broadcast %cst_71 : f32 to vector<8x1xf32>
    %111 = arith.maximumf %109, %110 : vector<8x1xf32>
    %cst_72 = arith.constant 9.99999974E-6 : f32
    %112 = vector.broadcast %cst_72 : f32 to vector<8x1xf32>
    %113 = arith.addf %111, %112 : vector<8x1xf32>
    %114 = math.rsqrt %113 : vector<8x1xf32>
    %c0_73 = arith.constant 0 : index
    %c0_74 = arith.constant 0 : index
    %115 = vector.load %arg4[%c0_73, %c0_74] : memref<8x1xf32, #tpu.memory_space<vmem>>, vector<8x1xf32>
    %116 = arith.mulf %114, %115 : vector<8x1xf32>
    %117 = vector.broadcast %105 : vector<8x1xf32> to vector<8x256xf32>
    %118 = arith.subf %98, %117 : vector<8x256xf32>
    %119 = vector.broadcast %116 : vector<8x1xf32> to vector<8x256xf32>
    %120 = arith.mulf %118, %119 : vector<8x256xf32>
    %c0_75 = arith.constant 0 : index
    %c0_76 = arith.constant 0 : index
    %121 = vector.load %arg5[%c0_75, %c0_76] : memref<8x1xf32, #tpu.memory_space<vmem>>, vector<8x1xf32>
    %122 = vector.broadcast %121 : vector<8x1xf32> to vector<8x256xf32>
    %123 = arith.addf %120, %122 : vector<8x256xf32>
    %cst_77 = arith.constant 0.000000e+00 : f32
    %124 = vector.broadcast %cst_77 : f32 to vector<8x256xf32>
    %125 = arith.maximumf %123, %124 : vector<8x256xf32>
    %c17_i32_78 = arith.constant 17 : i32
    %126 = tpu.dynamic_rotate %125 by %c17_i32_78 dim 1 : vector<8x256xf32>, i32 -> vector<8x256xf32>
    %c0_79 = arith.constant 0 : index
    %c0_80 = arith.constant 0 : index
    %c0_81 = arith.constant 0 : index
    %127 = vector.load %arg2[%c0_79, %c0_80, %c0_81] : memref<9x1x256xf32, #tpu.memory_space<vmem>>, vector<1x1x256xf32>
    %128 = vector.shape_cast %127 : vector<1x1x256xf32> to vector<1x256xf32>
    %129 = vector.broadcast %128 : vector<1x256xf32> to vector<8x256xf32>
    %130 = arith.mulf %126, %129 : vector<8x256xf32>
    %131 = arith.truncf %130 : vector<8x256xf32> to vector<8x256xbf16>
    %c0_82 = arith.constant 0 : index
    %c0_83 = arith.constant 0 : index
    %c0_84 = arith.constant 0 : index
    %132 = vector.load %arg10[%c0_82, %c0_83, %c0_84] : memref<2x24x256xbf16, #tpu.memory_space<vmem>>, vector<1x8x256xbf16>
    %133 = vector.shape_cast %132 : vector<1x8x256xbf16> to vector<8x256xbf16>
    %134 = vector.shape_cast %131 : vector<8x256xbf16> to vector<1x8x256xbf16>
    tpu.vector_store %arg10[%c0_82, %c0_83, %c0_84], %134 {strides = array<i32>} : memref<2x24x256xbf16, #tpu.memory_space<vmem>>, vector<1x8x256xbf16>,
    %c16_i32_85 = arith.constant 16 : i32
    %135 = tpu.dynamic_rotate %125 by %c16_i32_85 dim 1 : vector<8x256xf32>, i32 -> vector<8x256xf32>
    %c1_86 = arith.constant 1 : index
    %c0_87 = arith.constant 0 : index
    %c0_88 = arith.constant 0 : index
    %136 = vector.load %arg2[%c1_86, %c0_87, %c0_88] : memref<9x1x256xf32, #tpu.memory_space<vmem>>, vector<1x1x256xf32>
    %137 = vector.shape_cast %136 : vector<1x1x256xf32> to vector<1x256xf32>
    %138 = vector.broadcast %137 : vector<1x256xf32> to vector<8x256xf32>
    %139 = arith.mulf %135, %138 : vector<8x256xf32>
    %140 = arith.truncf %139 : vector<8x256xf32> to vector<8x256xbf16>
    %c0_89 = arith.constant 0 : index
    %c8_90 = arith.constant 8 : index
    %c0_91 = arith.constant 0 : index
    %141 = vector.load %arg10[%c0_89, %c8_90, %c0_91] : memref<2x24x256xbf16, #tpu.memory_space<vmem>>, vector<1x8x256xbf16>
    %142 = vector.shape_cast %141 : vector<1x8x256xbf16> to vector<8x256xbf16>
    %143 = vector.shape_cast %140 : vector<8x256xbf16> to vector<1x8x256xbf16>
    tpu.vector_store %arg10[%c0_89, %c8_90, %c0_91], %143 {strides = array<i32>} : memref<2x24x256xbf16, #tpu.memory_space<vmem>>, vector<1x8x256xbf16>,
    %c15_i32_92 = arith.constant 15 : i32
    %144 = tpu.dynamic_rotate %125 by %c15_i32_92 dim 1 : vector<8x256xf32>, i32 -> vector<8x256xf32>
    %c2_93 = arith.constant 2 : index
    %c0_94 = arith.constant 0 : index
    %c0_95 = arith.constant 0 : index
    %145 = vector.load %arg2[%c2_93, %c0_94, %c0_95] : memref<9x1x256xf32, #tpu.memory_space<vmem>>, vector<1x1x256xf32>
    %146 = vector.shape_cast %145 : vector<1x1x256xf32> to vector<1x256xf32>
    %147 = vector.broadcast %146 : vector<1x256xf32> to vector<8x256xf32>
    %148 = arith.mulf %144, %147 : vector<8x256xf32>
    %149 = arith.truncf %148 : vector<8x256xf32> to vector<8x256xbf16>
    %c0_96 = arith.constant 0 : index
    %c16_97 = arith.constant 16 : index
    %c0_98 = arith.constant 0 : index
    %150 = vector.load %arg10[%c0_96, %c16_97, %c0_98] : memref<2x24x256xbf16, #tpu.memory_space<vmem>>, vector<1x8x256xbf16>
    %151 = vector.shape_cast %150 : vector<1x8x256xbf16> to vector<8x256xbf16>
    %152 = vector.shape_cast %149 : vector<8x256xbf16> to vector<1x8x256xbf16>
    tpu.vector_store %arg10[%c0_96, %c16_97, %c0_98], %152 {strides = array<i32>} : memref<2x24x256xbf16, #tpu.memory_space<vmem>>, vector<1x8x256xbf16>,
    %c0_99 = arith.constant 0 : index
    %c0_100 = arith.constant 0 : index
    %c0_101 = arith.constant 0 : index
    %153 = vector.load %arg6[%c0_99, %c0_100, %c0_101] : memref<3x8x24xbf16, #tpu.memory_space<vmem>>, vector<1x8x24xbf16>
    %154 = vector.shape_cast %153 : vector<1x8x24xbf16> to vector<8x24xbf16>
    %c0_102 = arith.constant 0 : index
    %c0_103 = arith.constant 0 : index
    %c0_104 = arith.constant 0 : index
    %155 = vector.load %arg10[%c0_102, %c0_103, %c0_104] : memref<2x24x256xbf16, #tpu.memory_space<vmem>>, vector<1x24x256xbf16>
    %156 = vector.shape_cast %155 : vector<1x24x256xbf16> to vector<24x256xbf16>
    %cst_105 = arith.constant dense<0.000000e+00> : vector<8x256xf32>
    %157 = tpu.matmul %154, %156, %cst_105 {dimension_numbers = #tpu.dot_dimension_numbers<[1], [0], [0], [1], [0, 0, 1, 1], [], []>} : vector<8x24xbf16>, vector<24x256xbf16>, vector<8x256xf32> -> vector<8x256xf32>
    %c1_i32_106 = arith.constant 1 : i32
    %158 = tpu.dynamic_rotate %125 by %c1_i32_106 dim 1 : vector<8x256xf32>, i32 -> vector<8x256xf32>
    %c3_107 = arith.constant 3 : index
    %c0_108 = arith.constant 0 : index
    %c0_109 = arith.constant 0 : index
    %159 = vector.load %arg2[%c3_107, %c0_108, %c0_109] : memref<9x1x256xf32, #tpu.memory_space<vmem>>, vector<1x1x256xf32>
    %160 = vector.shape_cast %159 : vector<1x1x256xf32> to vector<1x256xf32>
    %161 = vector.broadcast %160 : vector<1x256xf32> to vector<8x256xf32>
    %162 = arith.mulf %158, %161 : vector<8x256xf32>
    %163 = arith.truncf %162 : vector<8x256xf32> to vector<8x256xbf16>
    %c1_110 = arith.constant 1 : index
    %c0_111 = arith.constant 0 : index
    %c0_112 = arith.constant 0 : index
    %164 = vector.load %arg10[%c1_110, %c0_111, %c0_112] : memref<2x24x256xbf16, #tpu.memory_space<vmem>>, vector<1x8x256xbf16>
    %165 = vector.shape_cast %164 : vector<1x8x256xbf16> to vector<8x256xbf16>
    %166 = vector.shape_cast %163 : vector<8x256xbf16> to vector<1x8x256xbf16>
    tpu.vector_store %arg10[%c1_110, %c0_111, %c0_112], %166 {strides = array<i32>} : memref<2x24x256xbf16, #tpu.memory_space<vmem>>, vector<1x8x256xbf16>,
    %c4_113 = arith.constant 4 : index
    %c0_114 = arith.constant 0 : index
    %c0_115 = arith.constant 0 : index
    %167 = vector.load %arg2[%c4_113, %c0_114, %c0_115] : memref<9x1x256xf32, #tpu.memory_space<vmem>>, vector<1x1x256xf32>
    %168 = vector.shape_cast %167 : vector<1x1x256xf32> to vector<1x256xf32>
    %169 = vector.broadcast %168 : vector<1x256xf32> to vector<8x256xf32>
    %170 = arith.mulf %125, %169 : vector<8x256xf32>
    %171 = arith.truncf %170 : vector<8x256xf32> to vector<8x256xbf16>
    %c1_116 = arith.constant 1 : index
    %c8_117 = arith.constant 8 : index
    %c0_118 = arith.constant 0 : index
    %172 = vector.load %arg10[%c1_116, %c8_117, %c0_118] : memref<2x24x256xbf16, #tpu.memory_space<vmem>>, vector<1x8x256xbf16>
    %173 = vector.shape_cast %172 : vector<1x8x256xbf16> to vector<8x256xbf16>
    %174 = vector.shape_cast %171 : vector<8x256xbf16> to vector<1x8x256xbf16>
    tpu.vector_store %arg10[%c1_116, %c8_117, %c0_118], %174 {strides = array<i32>} : memref<2x24x256xbf16, #tpu.memory_space<vmem>>, vector<1x8x256xbf16>,
    %c255_i32_119 = arith.constant 255 : i32
    %175 = tpu.dynamic_rotate %125 by %c255_i32_119 dim 1 : vector<8x256xf32>, i32 -> vector<8x256xf32>
    %c5_120 = arith.constant 5 : index
    %c0_121 = arith.constant 0 : index
    %c0_122 = arith.constant 0 : index
    %176 = vector.load %arg2[%c5_120, %c0_121, %c0_122] : memref<9x1x256xf32, #tpu.memory_space<vmem>>, vector<1x1x256xf32>
    %177 = vector.shape_cast %176 : vector<1x1x256xf32> to vector<1x256xf32>
    %178 = vector.broadcast %177 : vector<1x256xf32> to vector<8x256xf32>
    %179 = arith.mulf %175, %178 : vector<8x256xf32>
    %180 = arith.truncf %179 : vector<8x256xf32> to vector<8x256xbf16>
    %c1_123 = arith.constant 1 : index
    %c16_124 = arith.constant 16 : index
    %c0_125 = arith.constant 0 : index
    %181 = vector.load %arg10[%c1_123, %c16_124, %c0_125] : memref<2x24x256xbf16, #tpu.memory_space<vmem>>, vector<1x8x256xbf16>
    %182 = vector.shape_cast %181 : vector<1x8x256xbf16> to vector<8x256xbf16>
    %183 = vector.shape_cast %180 : vector<8x256xbf16> to vector<1x8x256xbf16>
    tpu.vector_store %arg10[%c1_123, %c16_124, %c0_125], %183 {strides = array<i32>} : memref<2x24x256xbf16, #tpu.memory_space<vmem>>, vector<1x8x256xbf16>,
    %c1_126 = arith.constant 1 : index
    %c0_127 = arith.constant 0 : index
    %c0_128 = arith.constant 0 : index
    %184 = vector.load %arg6[%c1_126, %c0_127, %c0_128] : memref<3x8x24xbf16, #tpu.memory_space<vmem>>, vector<1x8x24xbf16>
    %185 = vector.shape_cast %184 : vector<1x8x24xbf16> to vector<8x24xbf16>
    %c1_129 = arith.constant 1 : index
    %c0_130 = arith.constant 0 : index
    %c0_131 = arith.constant 0 : index
    %186 = vector.load %arg10[%c1_129, %c0_130, %c0_131] : memref<2x24x256xbf16, #tpu.memory_space<vmem>>, vector<1x24x256xbf16>
    %187 = vector.shape_cast %186 : vector<1x24x256xbf16> to vector<24x256xbf16>
    %cst_132 = arith.constant dense<0.000000e+00> : vector<8x256xf32>
    %188 = tpu.matmul %185, %187, %cst_132 {dimension_numbers = #tpu.dot_dimension_numbers<[1], [0], [0], [1], [0, 0, 1, 1], [], []>} : vector<8x24xbf16>, vector<24x256xbf16>, vector<8x256xf32> -> vector<8x256xf32>
    %189 = arith.addf %157, %188 : vector<8x256xf32>
    %c241_i32_133 = arith.constant 241 : i32
    %190 = tpu.dynamic_rotate %125 by %c241_i32_133 dim 1 : vector<8x256xf32>, i32 -> vector<8x256xf32>
    %c6_134 = arith.constant 6 : index
    %c0_135 = arith.constant 0 : index
    %c0_136 = arith.constant 0 : index
    %191 = vector.load %arg2[%c6_134, %c0_135, %c0_136] : memref<9x1x256xf32, #tpu.memory_space<vmem>>, vector<1x1x256xf32>
    %192 = vector.shape_cast %191 : vector<1x1x256xf32> to vector<1x256xf32>
    %193 = vector.broadcast %192 : vector<1x256xf32> to vector<8x256xf32>
    %194 = arith.mulf %190, %193 : vector<8x256xf32>
    %195 = arith.truncf %194 : vector<8x256xf32> to vector<8x256xbf16>
    %c0_137 = arith.constant 0 : index
    %c0_138 = arith.constant 0 : index
    %c0_139 = arith.constant 0 : index
    %196 = vector.load %arg10[%c0_137, %c0_138, %c0_139] : memref<2x24x256xbf16, #tpu.memory_space<vmem>>, vector<1x8x256xbf16>
    %197 = vector.shape_cast %196 : vector<1x8x256xbf16> to vector<8x256xbf16>
    %198 = vector.shape_cast %195 : vector<8x256xbf16> to vector<1x8x256xbf16>
    tpu.vector_store %arg10[%c0_137, %c0_138, %c0_139], %198 {strides = array<i32>} : memref<2x24x256xbf16, #tpu.memory_space<vmem>>, vector<1x8x256xbf16>,
    %c240_i32_140 = arith.constant 240 : i32
    %199 = tpu.dynamic_rotate %125 by %c240_i32_140 dim 1 : vector<8x256xf32>, i32 -> vector<8x256xf32>
    %c7_141 = arith.constant 7 : index
    %c0_142 = arith.constant 0 : index
    %c0_143 = arith.constant 0 : index
    %200 = vector.load %arg2[%c7_141, %c0_142, %c0_143] : memref<9x1x256xf32, #tpu.memory_space<vmem>>, vector<1x1x256xf32>
    %201 = vector.shape_cast %200 : vector<1x1x256xf32> to vector<1x256xf32>
    %202 = vector.broadcast %201 : vector<1x256xf32> to vector<8x256xf32>
    %203 = arith.mulf %199, %202 : vector<8x256xf32>
    %204 = arith.truncf %203 : vector<8x256xf32> to vector<8x256xbf16>
    %c0_144 = arith.constant 0 : index
    %c8_145 = arith.constant 8 : index
    %c0_146 = arith.constant 0 : index
    %205 = vector.load %arg10[%c0_144, %c8_145, %c0_146] : memref<2x24x256xbf16, #tpu.memory_space<vmem>>, vector<1x8x256xbf16>
    %206 = vector.shape_cast %205 : vector<1x8x256xbf16> to vector<8x256xbf16>
    %207 = vector.shape_cast %204 : vector<8x256xbf16> to vector<1x8x256xbf16>
    tpu.vector_store %arg10[%c0_144, %c8_145, %c0_146], %207 {strides = array<i32>} : memref<2x24x256xbf16, #tpu.memory_space<vmem>>, vector<1x8x256xbf16>,
    %c239_i32_147 = arith.constant 239 : i32
    %208 = tpu.dynamic_rotate %125 by %c239_i32_147 dim 1 : vector<8x256xf32>, i32 -> vector<8x256xf32>
    %c8_148 = arith.constant 8 : index
    %c0_149 = arith.constant 0 : index
    %c0_150 = arith.constant 0 : index
    %209 = vector.load %arg2[%c8_148, %c0_149, %c0_150] : memref<9x1x256xf32, #tpu.memory_space<vmem>>, vector<1x1x256xf32>
    %210 = vector.shape_cast %209 : vector<1x1x256xf32> to vector<1x256xf32>
    %211 = vector.broadcast %210 : vector<1x256xf32> to vector<8x256xf32>
    %212 = arith.mulf %208, %211 : vector<8x256xf32>
    %213 = arith.truncf %212 : vector<8x256xf32> to vector<8x256xbf16>
    %c0_151 = arith.constant 0 : index
    %c16_152 = arith.constant 16 : index
    %c0_153 = arith.constant 0 : index
    %214 = vector.load %arg10[%c0_151, %c16_152, %c0_153] : memref<2x24x256xbf16, #tpu.memory_space<vmem>>, vector<1x8x256xbf16>
    %215 = vector.shape_cast %214 : vector<1x8x256xbf16> to vector<8x256xbf16>
    %216 = vector.shape_cast %213 : vector<8x256xbf16> to vector<1x8x256xbf16>
    tpu.vector_store %arg10[%c0_151, %c16_152, %c0_153], %216 {strides = array<i32>} : memref<2x24x256xbf16, #tpu.memory_space<vmem>>, vector<1x8x256xbf16>,
    %c2_154 = arith.constant 2 : index
    %c0_155 = arith.constant 0 : index
    %c0_156 = arith.constant 0 : index
    %217 = vector.load %arg6[%c2_154, %c0_155, %c0_156] : memref<3x8x24xbf16, #tpu.memory_space<vmem>>, vector<1x8x24xbf16>
    %218 = vector.shape_cast %217 : vector<1x8x24xbf16> to vector<8x24xbf16>
    %c0_157 = arith.constant 0 : index
    %c0_158 = arith.constant 0 : index
    %c0_159 = arith.constant 0 : index
    %219 = vector.load %arg10[%c0_157, %c0_158, %c0_159] : memref<2x24x256xbf16, #tpu.memory_space<vmem>>, vector<1x24x256xbf16>
    %220 = vector.shape_cast %219 : vector<1x24x256xbf16> to vector<24x256xbf16>
    %cst_160 = arith.constant dense<0.000000e+00> : vector<8x256xf32>
    %221 = tpu.matmul %218, %220, %cst_160 {dimension_numbers = #tpu.dot_dimension_numbers<[1], [0], [0], [1], [0, 0, 1, 1], [], []>} : vector<8x24xbf16>, vector<24x256xbf16>, vector<8x256xf32> -> vector<8x256xf32>
    %222 = arith.addf %189, %221 : vector<8x256xf32>
    %cst_161 = arith.constant dense<0.000000e+00> : vector<8xf32>
    %223 = vector.multi_reduction <add>, %222, %cst_161 [1] : vector<8x256xf32> to vector<8xf32>
    %224 = vector.shape_cast %223 : vector<8xf32> to vector<8x1xf32>
    %225 = arith.mulf %222, %222 : vector<8x256xf32>
    %cst_162 = arith.constant dense<0.000000e+00> : vector<8xf32>
    %226 = vector.multi_reduction <add>, %225, %cst_162 [1] : vector<8x256xf32> to vector<8xf32>
    %227 = vector.shape_cast %226 : vector<8xf32> to vector<8x1xf32>
    %cst_163 = arith.constant 3.906250e-03 : f32
    %228 = vector.broadcast %cst_163 : f32 to vector<8x1xf32>
    %229 = arith.mulf %224, %228 : vector<8x1xf32>
    %cst_164 = arith.constant 3.906250e-03 : f32
    %230 = vector.broadcast %cst_164 : f32 to vector<8x1xf32>
    %231 = arith.mulf %227, %230 : vector<8x1xf32>
    %232 = arith.mulf %229, %229 : vector<8x1xf32>
    %233 = arith.subf %231, %232 : vector<8x1xf32>
    %cst_165 = arith.constant 0.000000e+00 : f32
    %234 = vector.broadcast %cst_165 : f32 to vector<8x1xf32>
    %235 = arith.maximumf %233, %234 : vector<8x1xf32>
    %cst_166 = arith.constant 9.99999974E-6 : f32
    %236 = vector.broadcast %cst_166 : f32 to vector<8x1xf32>
    %237 = arith.addf %235, %236 : vector<8x1xf32>
    %238 = math.rsqrt %237 : vector<8x1xf32>
    %c0_167 = arith.constant 0 : index
    %c0_168 = arith.constant 0 : index
    %239 = vector.load %arg7[%c0_167, %c0_168] : memref<8x1xf32, #tpu.memory_space<vmem>>, vector<8x1xf32>
    %240 = arith.mulf %238, %239 : vector<8x1xf32>
    %241 = vector.broadcast %229 : vector<8x1xf32> to vector<8x256xf32>
    %242 = arith.subf %222, %241 : vector<8x256xf32>
    %243 = vector.broadcast %240 : vector<8x1xf32> to vector<8x256xf32>
    %244 = arith.mulf %242, %243 : vector<8x256xf32>
    %c0_169 = arith.constant 0 : index
    %c0_170 = arith.constant 0 : index
    %245 = vector.load %arg8[%c0_169, %c0_170] : memref<8x1xf32, #tpu.memory_space<vmem>>, vector<8x1xf32>
    %246 = vector.broadcast %245 : vector<8x1xf32> to vector<8x256xf32>
    %247 = arith.addf %244, %246 : vector<8x256xf32>
    %248 = arith.addf %1, %247 : vector<8x256xf32>
    %c0_171 = arith.constant 0 : index
    %c0_172 = arith.constant 0 : index
    %c0_173 = arith.constant 0 : index
    %249 = vector.load %arg9[%c0_171, %c0_172, %c0_173] : memref<1x8x256xf32, #tpu.memory_space<vmem>>, vector<1x8x256xf32>
    %250 = vector.shape_cast %249 : vector<1x8x256xf32> to vector<8x256xf32>
    %251 = vector.shape_cast %248 : vector<8x256xf32> to vector<1x8x256xf32>
    tpu.vector_store %arg9[%c0_171, %c0_172, %c0_173], %251 {strides = array<i32>} : memref<1x8x256xf32, #tpu.memory_space<vmem>>, vector<1x8x256xf32>,
    return
  }
  func.func @transform_0(%arg0: i32) -> (i32, i32, i32) {
    %c0_i32 = arith.constant 0 : i32
    %c0_i32_0 = arith.constant 0 : i32
    %c0_i32_1 = arith.constant 0 : i32
    return %arg0, %c0_i32, %c0_i32_0 : i32, i32, i32
  }
  func.func @transform_1(%arg0: i32) -> (i32, i32, i32) {
    %c0_i32 = arith.constant 0 : i32
    %c0_i32_0 = arith.constant 0 : i32
    %c0_i32_1 = arith.constant 0 : i32
    %c0_i32_2 = arith.constant 0 : i32
    return %c0_i32, %c0_i32_0, %c0_i32_1 : i32, i32, i32
  }
  func.func @transform_2(%arg0: i32) -> (i32, i32, i32) {
    %c0_i32 = arith.constant 0 : i32
    %c0_i32_0 = arith.constant 0 : i32
    %c0_i32_1 = arith.constant 0 : i32
    %c0_i32_2 = arith.constant 0 : i32
    return %c0_i32, %c0_i32_0, %c0_i32_1 : i32, i32, i32
  }
  func.func @transform_3(%arg0: i32) -> (i32, i32) {
    %c0_i32 = arith.constant 0 : i32
    %c0_i32_0 = arith.constant 0 : i32
    %c0_i32_1 = arith.constant 0 : i32
    return %c0_i32, %c0_i32_0 : i32, i32
  }
  func.func @transform_4(%arg0: i32) -> (i32, i32) {
    %c0_i32 = arith.constant 0 : i32
    %c0_i32_0 = arith.constant 0 : i32
    %c0_i32_1 = arith.constant 0 : i32
    return %c0_i32, %c0_i32_0 : i32, i32
  }
  func.func @transform_5(%arg0: i32) -> (i32, i32, i32) {
    %c0_i32 = arith.constant 0 : i32
    %c0_i32_0 = arith.constant 0 : i32
    %c0_i32_1 = arith.constant 0 : i32
    %c0_i32_2 = arith.constant 0 : i32
    return %c0_i32, %c0_i32_0, %c0_i32_1 : i32, i32, i32
  }
  func.func @transform_6(%arg0: i32) -> (i32, i32) {
    %c0_i32 = arith.constant 0 : i32
    %c0_i32_0 = arith.constant 0 : i32
    %c0_i32_1 = arith.constant 0 : i32
    return %c0_i32, %c0_i32_0 : i32, i32
  }
  func.func @transform_7(%arg0: i32) -> (i32, i32) {
    %c0_i32 = arith.constant 0 : i32
    %c0_i32_0 = arith.constant 0 : i32
    %c0_i32_1 = arith.constant 0 : i32
    return %c0_i32, %c0_i32_0 : i32, i32
  }
  func.func @transform_8(%arg0: i32) -> (i32, i32, i32) {
    %c0_i32 = arith.constant 0 : i32
    %c0_i32_0 = arith.constant 0 : i32
    %c0_i32_1 = arith.constant 0 : i32
    return %arg0, %c0_i32, %c0_i32_0 : i32, i32, i32
  }
}

</mosaic_0001>

<bundles_post_ra>
// kernel: residual_block.1
= control target key start
LH: loop header
LB: loop body
LE: loop exit
PB: predicated region body
PF: predicated region fallthrough
CT: control target
= control target key end

     0   :  { %s1621_s27 = smov 0   ;;  %s1925_s0 = inlined_call_operand.vmem [shape: f32[2,8,256], index: 0, kind: input, shape index: {}]   ;;  %s1926_s1 = inlined_call_operand.vmem [shape: f32[9,1,256], index: 1, kind: input, shape index: {}]   ;;  %s1927_s2 = inlined_call_operand.vmem [shape: bf16[3,8,24], index: 2, kind: input, shape index: {}]   ;;  %s1928_s3 = inlined_call_operand.vmem [shape: f32[8,1], index: 3, kind: input, shape index: {}]   ;;  %s1929_s4 = inlined_call_operand.vmem [shape: f32[8,1], index: 4, kind: input, shape index: {}]   ;;  %s1930_s5 = inlined_call_operand.vmem [shape: bf16[3,8,24], index: 5, kind: input, shape index: {}]   ;;  %s1931_s6 = inlined_call_operand.vmem [shape: f32[8,1], index: 6, kind: input, shape index: {}]   ;;  %s1932_s7 = inlined_call_operand.vmem [shape: f32[8,1], index: 7, kind: input, shape index: {}]   ;;  %s1933_s8 = inlined_call_operand.vmem [shape: f32[2,8,256], index: 8, kind: output, shape index: {}]  }
   0x1 LB: > { %s1391_s28 = sadd.s32 4294967295, %s1565_s27   ;;  %p1395_p0 = scmp.ge.s32.totalorder %s1565_s27, 1  ;;  %s1565_s27 = sphi %s1621_s27, %s18_s27  }
   0x2   : > { %p262_p1 = scmp.lt.s32.totalorder %s1565_s27, 3 }
   0x4   : > { %p263_p2 = pnand %p1395_p0, %p262_p1 }
   0x5   : > { %p296_p3 = scmp.lt.s32.totalorder (!%p263_p2), %s1391_s28, 1  ;;  %s1567_s11 = smov (!%p263_p2), 127   ;;  %v1569_v2 = vmov (!%p263_p2), 0   ;;  %v313_v3 = vlaneseq (!%p263_p2)  ;;  %v1407_v8 = vld [vmem:[%s1926_s1 + $0x8] sm:$0x3] (!%p263_p2)  ;;  %vm518_vm4 = vcmask (!%p263_p2), 1043456  }
   0x6   : > { %266 = sbr.rel (%p263_p2) target bundleno = 1366 (0x556), region = 52  ;;  %s1568_s12 = smov (!%p263_p2), 1   ;;  %557 = vmatprep.mubr.bf16.mxu0 (!%p263_p2), %v1569_v2  ;;  %1553 = vset.pattern.permute.xlu0 (!%p263_p2), %v1569_v2  ;;  %v1409_v9 = vld [vmem:[%s1926_s1 + $0xa] sm:$0x3] (!%p263_p2)  ;;  %v1405_v10 = vld [vmem:[%s1926_s1 + $0x6] sm:$0x3] (!%p263_p2) }
   0x7   : > { %1554 = vset.pattern.permute.xlu1 (!%p263_p2), %v1569_v2  ;;  %1065 = vmatprep.mubr.bf16.mxu1 (!%p263_p2), %v1569_v2  ;;  %s1570_s13 = smov (!%p263_p2), 17   ;;  %s1571_s14 = smov (!%p263_p2), 16   ;;  %v321_v4 = vshrl.u32 (!%p263_p2), %v313_v3, 7  ;;  %v1681_v7 = vand.u32 (!%p263_p2), 127, %v313_v3  ;;  %v318_v27 = vld [vmem:[%s1926_s1] sm:$0x3] (!%p263_p2) }
   0x8   : > { %s1572_s15 = smov (!%p263_p2), 15   ;;  %s1573_s16 = smov (!%p263_p2), 113   ;;  %v1401_v32 = vld [vmem:[%s1926_s1 + $0x2] sm:$0x3] (!%p263_p2)  ;;  %v1403_v45 = vld [vmem:[%s1926_s1 + $0x4] sm:$0x3] (!%p263_p2) }
   0x9   : > { %s1574_s17 = smov (!%p263_p2), 112   ;;  %s1575_s18 = smov (!%p263_p2), 111   ;;  %v1677_v5 = vsub.s32 (!%p263_p2), 0, %v321_v4  ;;  %v1679_v6 = vsub.s32 (!%p263_p2), 1, %v321_v4  ;;  %vm467_vm0 = vcmp.lt.s32.totalorder (!%p263_p2), %v1681_v7, 127  ;;  %vm411_vm1 = vcmp.lt.s32.totalorder (!%p263_p2), %v1681_v7, 1 }
   0xa   : > { %vm315_vm2 = vcmp.lt.s32.totalorder (!%p263_p2), %v1681_v7, 17  ;;  %vm345_vm3 = vcmp.lt.s32.totalorder (!%p263_p2), %v1681_v7, 16  ;;  %vm376_vm5 = vcmp.lt.s32.totalorder (!%p263_p2), %v1681_v7, 15  ;;  %v1411_v57 = vld [vmem:[%s1927_s2 + $0x4] sm:$0xf] (!%p263_p2)  ;;  %vm514_vm6 = vcmask (!%p263_p2), 195584  }
   0xb   : > { %v449_v13 = vrot.slane (!%p263_p2), %v1407_v8, %v1679_v6  ;;  %v445_v14 = vrot.slane (!%p263_p2), %v1407_v8, %v1677_v5  ;;  %v476_v15 = vrot.slane (!%p263_p2), %v1409_v9, %v1677_v5  ;;  %v480_v16 = vrot.slane (!%p263_p2), %v1409_v9, %v1679_v6  ;;  %v1424_v3 = vld [vmem:[%s1926_s1 + $0xc] sm:$0x3] (!%p263_p2)  ;;  %v1426_v9 = vld [vmem:[%s1926_s1 + $0xe] sm:$0x3] (!%p263_p2) }
   0xc   : > { %v420_v17 = vrot.slane (!%p263_p2), %v1405_v10, %v1677_v5  ;;  %v424_v18 = vrot.slane (!%p263_p2), %v1405_v10, %v1679_v6  ;;  %v323_v34 = vrot.slane (!%p263_p2), %v318_v27, %v1677_v5  ;;  %v327_v35 = vrot.slane (!%p263_p2), %v318_v27, %v1679_v6 }
   0xd   : > { %s1935_s28 = smov (!%p296_p3, %s1391_s28), 1  ;;  %v354_v43 = vrot.slane %v1401_v32, %v1677_v5  ;;  %v358_v44 = vrot.slane %v1401_v32, %v1679_v6  ;;  %v385_v52 = vrot.slane %v1403_v45, %v1677_v5  ;;  %v389_v56 = vrot.slane %v1403_v45, %v1679_v6  ;;  %v403_v32 = vld [vmem:[%s1927_s2] sm:$0xf] }
   0xe   : > { %s1476_s29 = sshll.u32 %s1935_s28, 4  ;;  %vm635_vm7 = vcmp.lt.s32.totalorder %v1681_v7, 113  ;;  %vm666_vm8 = vcmp.lt.s32.totalorder %v1681_v7, 112  ;;  %vm697_vm9 = vcmp.lt.s32.totalorder %v1681_v7, 111 }
   0xf   : > { %s300_s10 = scalar_lea.vmem %s1925_s0, %s1476_s29  ;;  %s305_s9 = scalar_lea.vmem %s1933_s8, %s1476_s29 }
  0x10   : > { %v1637_v0 = vld [vmem:[%s300_s10] sm:$0xff]  ;;  %v1643_v1 = vld [vmem:[%s300_s10 + $0x8] sm:$0xff] }
  0x11   : > { %463 = vrot.lane.b32.xlu1 %v1637_v0, %s1567_s11  ;;  %407 = vrot.lane.b32.xlu0 %v1637_v0, %s1568_s12  ;;  %v453_v21 = vmul.f32 %v449_v13, %v1643_v1  ;;  %v452_v22 = vmul.f32 %v445_v14, %v1637_v0  ;;  %v644_v13 = vrot.slane %v1424_v3, %v1677_v5 }
  0x12   : > { %v648_v14 = vrot.slane %v1424_v3, %v1679_v6  ;;  %v811_v3 = vld [vmem:[%s1928_s3] sm:$0xff] }
  0x15   : > { %465 = vrot.lane.b32.xlu1 %v1643_v1, %s1567_s11  ;;  %409 = vrot.lane.b32.xlu0 %v1643_v1, %s1568_s12 }
  0x19   : > { %311 = vrot.lane.b32.xlu1 %v1643_v1, %s1570_s13  ;;  %309 = vrot.lane.b32.xlu0 %v1637_v0, %s1570_s13 }
  0x1d   : > { %343 = vrot.lane.b32.xlu1 %v1643_v1, %s1571_s14  ;;  %341 = vrot.lane.b32.xlu0 %v1637_v0, %s1571_s14 }
  0x21   : > { %374 = vrot.lane.b32.xlu1 %v1643_v1, %s1572_s15  ;;  %372 = vrot.lane.b32.xlu0 %v1637_v0, %s1572_s15 }
  0x25   : > { %633 = vrot.lane.b32.xlu1 %v1643_v1, %s1573_s16  ;;  %631 = vrot.lane.b32.xlu0 %v1637_v0, %s1573_s16 }
  0x29   : > { %664 = vrot.lane.b32.xlu1 %v1643_v1, %s1574_s17  ;;  %662 = vrot.lane.b32.xlu0 %v1637_v0, %s1574_s17 }
  0x2d   : > { %695 = vrot.lane.b32.xlu1 %v1643_v1, %s1575_s18  ;;  %693 = vrot.lane.b32.xlu0 %v1637_v0, %s1575_s18 }
  0x83   : > { %v464_v11 = vpop.permute.xlu1 %463  ;;  %v408_v12 = vpop.permute.xlu0 %407 }
  0x87   : > { %v466_v19 = vpop.permute.xlu1 %465  ;;  %v410_v20 = vpop.permute.xlu0 %409 }
  0x88   : > { %v468_v23 = vsel %vm467_vm0, %v464_v11, %v466_v19  ;;  %v469_v24 = vsel %vm467_vm0, %v466_v19, %v464_v11  ;;  %v412_v25 = vsel %vm411_vm1, %v408_v12, %v410_v20  ;;  %v413_v26 = vsel %vm411_vm1, %v410_v20, %v408_v12 }
  0x89   : > { %v483_v28 = vmul.f32 %v476_v15, %v468_v23  ;;  %v484_v29 = vmul.f32 %v480_v16, %v469_v24  ;;  %v427_v30 = vmul.f32 %v420_v17, %v413_v26  ;;  %v428_v31 = vmul.f32 %v424_v18, %v412_v25 }
  0x8a   : > { %v675_v18 = vrot.slane %v1426_v9, %v1677_v5  ;;  %v679_v19 = vrot.slane %v1426_v9, %v1679_v6 }
  0x8b   : > { %v312_v33 = vpop.permute.xlu1 %311  ;;  %v310_v36 = vpop.permute.xlu0 %309  ;;  %v1497_v37 = vpack.c.bf16 %v453_v21, %v428_v31  ;;  %v1496_v38 = vpack.c.bf16 %v452_v22, %v427_v30  ;;  %v1498_v41 = vpack.c.bf16 %v483_v28, %v483_v28  ;;  %v1499_v42 = vpack.c.bf16 %v484_v29, %v484_v29  ;;  %v1428_v21 = vld [vmem:[%s1926_s1 + $0x10] sm:$0x3] }
  0x8c   : > { %v316_v39 = vsel %vm315_vm2, %v310_v36, %v312_v33  ;;  %v317_v40 = vsel %vm315_vm2, %v312_v33, %v310_v36  ;;  %v706_v30 = vrot.slane %v1428_v21, %v1677_v5  ;;  %v710_v31 = vrot.slane %v1428_v21, %v1679_v6 }
  0x8d   : > { %525 = vmatprep.subr.bf16.mxu0 %v1497_v37  ;;  %v330_v46 = vmul.f32 %v323_v34, %v317_v40  ;;  %v331_v47 = vmul.f32 %v327_v35, %v316_v39  ;;  %v520_v55 = vsel %vm518_vm4, %v1498_v41, 0 }
  0x8e   : > { %526 = vmatpush1.bf16.msra.mxu0 %v1496_v38 }
  0x8f   : > { %v344_v48 = vpop.permute.xlu1 %343  ;;  %v342_v49 = vpop.permute.xlu0 %341  ;;  %1416 = vmatprep.subr.msk.bf16.mxu0 %vm518_vm4, %v1499_v42 }
  0x90   : > { %v346_v50 = vsel %vm345_vm3, %v342_v49, %v344_v48  ;;  %v347_v51 = vsel %vm345_vm3, %v344_v48, %v342_v49 }
  0x91   : > { %v361_v53 = vmul.f32 %v354_v43, %v347_v51  ;;  %v362_v54 = vmul.f32 %v358_v44, %v346_v50  ;;  %v1430_v44 = vld [vmem:[%s1927_s2 + $0x8] sm:$0xf] }
  0x92   : > { %528 = vmatpush1.bf16.msra.mxu0 %v520_v55 }
  0x93   : > { %v1500_v58 = vpack.c.bf16 %v361_v53, %v330_v46  ;;  %v375_v59 = vpop.permute.xlu1 %374  ;;  %v373_v60 = vpop.permute.xlu0 %372  ;;  %v1501_v61 = vpack.c.bf16 %v362_v54, %v331_v47  ;;  %v822_v53 = vld [vmem:[%s1929_s4] sm:$0xff] }
  0x94   : > { %v377_v62 = vsel %vm376_vm5, %v373_v60, %v375_v59  ;;  %v378_v63 = vsel %vm376_vm5, %v375_v59, %v373_v60 }
  0x95   : > { %v392_v4 = vmul.f32 %v385_v52, %v378_v63  ;;  %v393_v8 = vmul.f32 %v389_v56, %v377_v62  ;;  %1417 = vmatmul.mubr.msk.bf16.vlgmr.msra.gmra.mrb[0].mxu0 %vm514_vm6, %v1411_v57  ;;  %590 = vmatprep.subr.bf16.mxu0 %v1501_v61 }
  0x96   : > { %591 = vmatpush1.bf16.msra.mxu0 %v1500_v58  ;;  %622 = vmatprep.mubr.bf16.mxu0 %v1569_v2 }
  0x97   : > { %v1502_v10 = vpack.c.bf16 %v392_v4, %v392_v4  ;;  %v1503_v11 = vpack.c.bf16 %v393_v8, %v393_v8  ;;  %v634_v12 = vpop.permute.xlu1 %633  ;;  %v632_v15 = vpop.permute.xlu0 %631 }
  0x98   : > { %v636_v16 = vsel %vm635_vm7, %v632_v15, %v634_v12  ;;  %v637_v17 = vsel %vm635_vm7, %v634_v12, %v632_v15 }
  0x99   : > { %1422 = vmatprep.subr.msk.bf16.mxu0 %vm518_vm4, %v1503_v11  ;;  %v585_v20 = vsel %vm518_vm4, %v1502_v10, 0  ;;  %v651_v22 = vmul.f32 %v644_v13, %v636_v16  ;;  %v652_v23 = vmul.f32 %v648_v14, %v637_v17  ;;  %v1442_v17 = vld [vmem:[%s1926_s1 + $0x6] sm:$0x3] }
  0x9a   : > { %593 = vmatpush1.bf16.msra.mxu0 %v585_v20  ;;  %v934_v20 = vrot.slane %v1442_v17, %v1677_v5  ;;  %v938_v21 = vrot.slane %v1442_v17, %v1679_v6 }
  0x9b   : > { %v665_v24 = vpop.permute.xlu1 %664  ;;  %v663_v25 = vpop.permute.xlu0 %662 }
  0x9c   : > { %v667_v26 = vsel %vm666_vm8, %v663_v25, %v665_v24  ;;  %v668_v27 = vsel %vm666_vm8, %v665_v24, %v663_v25 }
  0x9d   : > { %v682_v28 = vmul.f32 %v675_v18, %v667_v26  ;;  %v683_v29 = vmul.f32 %v679_v19, %v668_v27  ;;  %v1444_v18 = vld [vmem:[%s1926_s1 + $0x8] sm:$0x3] }
  0x9f   : > { %v1504_v33 = vpack.c.bf16 %v682_v28, %v651_v22  ;;  %v1505_v34 = vpack.c.bf16 %v683_v29, %v652_v23  ;;  %v696_v35 = vpop.permute.xlu1 %695  ;;  %v694_v36 = vpop.permute.xlu0 %693  ;;  %v961_v22 = vrot.slane %v1444_v18, %v1679_v6  ;;  %v957_v23 = vrot.slane %v1444_v18, %v1677_v5  ;;  %v1461_v18 = vld [vmem:[%s1926_s1 + $0xc] sm:$0x3] }
  0xa0   : > { %v698_v37 = vsel %vm697_vm9, %v694_v36, %v696_v35  ;;  %v699_v38 = vsel %vm697_vm9, %v696_v35, %v694_v36 }
  0xa1   : > { %1423 = vmatmul.mubr.msk.bf16.vlgmr.msra.gmra.mrb[0].mxu0 %vm514_vm6, %v403_v32  ;;  %753 = vmatprep.subr.bf16.mxu0 %v1505_v34  ;;  %v713_v39 = vmul.f32 %v706_v30, %v698_v37  ;;  %v714_v40 = vmul.f32 %v710_v31, %v699_v38  ;;  %v1446_v31 = vld [vmem:[%s1926_s1 + $0xa] sm:$0x3] }
  0xa2   : > { %754 = vmatpush1.bf16.msra.mxu0 %v1504_v33  ;;  %785 = vmatprep.mubr.bf16.mxu0 %v1569_v2  ;;  %v986_v35 = vrot.slane %v1446_v31, %v1677_v5  ;;  %v990_v36 = vrot.slane %v1446_v31, %v1679_v6 }
  0xa3   : > { %v1506_v41 = vpack.c.bf16 %v713_v39, %v713_v39  ;;  %v1507_v42 = vpack.c.bf16 %v714_v40, %v714_v40 }
  0xa5   : > { %1435 = vmatprep.subr.msk.bf16.mxu0 %vm518_vm4, %v1507_v42  ;;  %v748_v43 = vsel %vm518_vm4, %v1506_v41, 0 }
  0xa6   : > { %756 = vmatpush1.bf16.msra.mxu0 %v748_v43 }
  0xad   : > { %1436 = vmatmul.mubr.msk.bf16.vlgmr.msra.gmra.mrb[0].mxu0 %vm514_vm6, %v1430_v44 }
 0x180   : > { %v787_v45 = vpop.f32.mrb[0].mxu0 }
 0x181   : > { %v789_v46 = vpop.f32.mrb[1].mxu0  ;;  %v799_v47 = vmul.f32 %v787_v45, %v787_v45 }
 0x182   : > { %v791_v48 = vpop.f32.mrb[2].mxu0  ;;  %v796_v49 = vadd.f32 %v789_v46, %v787_v45  ;;  %v800_v50 = vmul.f32 %v789_v46, %v789_v46 }
 0x183   : > { %v792_v51 = vpop.f32.mrb[3].mxu0  ;;  %v1438_v48 = vld [vmem:[%s1926_s1 + $0x2] sm:$0x3] }
 0x184   : > { %797 = vadd.xlane.f32.xlu0 %v796_v49  ;;  %v801_v52 = vadd.f32 %v800_v50, %v799_v47  ;;  %v838_v47 = vld [vmem:[%s1926_s1] sm:$0x3]  ;;  %v1448_v49 = vld [vmem:[%s1930_s5 + $0x4] sm:$0xf] }
 0x186   : > { %802 = vadd.xlane.f32.xlu1 %v801_v52  ;;  %v843_v52 = vrot.slane %v838_v47, %v1677_v5 }
 0x197   : > { %825 = vperm.xlu1 %1554, %v822_v53   ;;  %v847_v53 = vrot.slane %v838_v47, %v1679_v6 }
 0x211   : > { %v798_v54 = vpop.xlane.xlu0 %797 }
 0x212   : > { %v804_v55 = vmul.f32 0.00390625, %v798_v54  ;;  %v872_v54 = vrot.slane %v1438_v48, %v1677_v5 }
 0x213   : > { %v803_v56 = vpop.xlane.xlu1 %802 }
 0x214   : > { %v805_v57 = vmul.f32 0.00390625, %v803_v56  ;;  %v806_v58 = vmul.f32 %v804_v55, %v804_v55  ;;  %v813_v59 = vsub.f32 %v787_v45, %v804_v55  ;;  %v814_v60 = vsub.f32 %v789_v46, %v804_v55  ;;  %v1440_v56 = vld [vmem:[%s1926_s1 + $0x4] sm:$0x3] }
 0x215   : > { %v876_v55 = vrot.slane %v1438_v48, %v1679_v6 }
 0x216   : > { %v807_v61 = vsub.f32 %v805_v57, %v806_v58 }
 0x217   : > { %v826_v10 = vpop.permute.xlu1 %825 }
 0x218   : > { %v808_v62 = vmax.f32 %v807_v61, 0.0 }
 0x21a   : > { %v809_v63 = vadd.f32 1e-05, %v808_v62  ;;  %v901_v62 = vrot.slane %v1440_v56, %v1677_v5 }
 0x21c   : > { %1555 = vrsqrt.f32 %v809_v63  ;;  %v905_v63 = vrot.slane %v1440_v56, %v1679_v6 }
 0x226   : > { %v1556_v4 = vpop.eup %1555 }
 0x227   : > { %v812_v8 = vmul.f32 %v1556_v4, %v811_v3 }
 0x229   : > { %817 = vperm.xlu0 %1553, %v812_v8  }
 0x2a8   : > { %v818_v9 = vpop.permute.xlu0 %817 }
 0x2a9   : > { %v820_v11 = vmul.f32 %v818_v9, %v813_v59  ;;  %v821_v12 = vmul.f32 %v818_v9, %v814_v60 }
 0x2ab   : > { %v828_v13 = vadd.f32 %v826_v10, %v820_v11  ;;  %v829_v14 = vadd.f32 %v826_v10, %v821_v12 }
 0x2ad   : > { %v830_v15 = vmax.f32 %v828_v13, 0.0  ;;  %v831_v16 = vmax.f32 %v829_v14, 0.0 }
 0x2af   : > { %861 = vrot.lane.b32.xlu0 %v830_v15, %s1571_s14  ;;  %923 = vrot.lane.b32.xlu1 %v830_v15, %s1568_s12  ;;  %v965_v29 = vmul.f32 %v961_v22, %v831_v16  ;;  %v964_v30 = vmul.f32 %v957_v23, %v830_v15  ;;  %v1150_v23 = vrot.slane %v1461_v18, %v1677_v5 }
 0x2b3   : > { %890 = vrot.lane.b32.xlu0 %v830_v15, %s1572_s15  ;;  %925 = vrot.lane.b32.xlu1 %v831_v16, %s1568_s12 }
 0x2b7   : > { %1139 = vrot.lane.b32.xlu0 %v830_v15, %s1573_s16  ;;  %975 = vrot.lane.b32.xlu1 %v830_v15, %s1567_s11 }
 0x2bb   : > { %1168 = vrot.lane.b32.xlu0 %v830_v15, %s1574_s17  ;;  %977 = vrot.lane.b32.xlu1 %v831_v16, %s1567_s11 }
 0x2bf   : > { %1197 = vrot.lane.b32.xlu0 %v830_v15, %s1575_s18  ;;  %832 = vrot.lane.b32.xlu1 %v830_v15, %s1570_s13 }
 0x2c3   : > { %834 = vrot.lane.b32.xlu1 %v831_v16, %s1570_s13 }
 0x2c7   : > { %863 = vrot.lane.b32.xlu1 %v831_v16, %s1571_s14 }
 0x2cb   : > { %892 = vrot.lane.b32.xlu1 %v831_v16, %s1572_s15 }
 0x2cf   : > { %1141 = vrot.lane.b32.xlu1 %v831_v16, %s1573_s16 }
 0x2d3   : > { %1170 = vrot.lane.b32.xlu1 %v831_v16, %s1574_s17 }
 0x2d7   : > { %1199 = vrot.lane.b32.xlu1 %v831_v16, %s1575_s18 }
 0x321   : > { %v924_v19 = vpop.permute.xlu1 %923  ;;  %v862_v42 = vpop.permute.xlu0 %861 }
 0x325   : > { %v926_v24 = vpop.permute.xlu1 %925  ;;  %v891_v51 = vpop.permute.xlu0 %890 }
 0x326   : > { %v927_v25 = vsel %vm411_vm1, %v924_v19, %v926_v24  ;;  %v928_v26 = vsel %vm411_vm1, %v926_v24, %v924_v19  ;;  %v1463_v19 = vld [vmem:[%s1926_s1 + $0xe] sm:$0x3] }
 0x327   : > { %v941_v27 = vmul.f32 %v934_v20, %v928_v26  ;;  %v942_v28 = vmul.f32 %v938_v21, %v927_v25  ;;  %v1154_v25 = vrot.slane %v1461_v18, %v1679_v6 }
 0x329   : > { %v976_v32 = vpop.permute.xlu1 %975  ;;  %v1509_v33 = vpack.c.bf16 %v965_v29, %v942_v28  ;;  %v1508_v34 = vpack.c.bf16 %v964_v30, %v941_v27  ;;  %v1140_v10 = vpop.permute.xlu0 %1139  ;;  %v1179_v27 = vrot.slane %v1463_v19, %v1677_v5  ;;  %v1183_v28 = vrot.slane %v1463_v19, %v1679_v6  ;;  %v1465_v29 = vld [vmem:[%s1926_s1 + $0x10] sm:$0x3] }
 0x32b   : > { %1033 = vmatprep.subr.bf16.mxu1 %v1509_v33 }
 0x32c   : > { %1034 = vmatpush1.bf16.msra.mxu1 %v1508_v34 }
 0x32d   : > { %v978_v37 = vpop.permute.xlu1 %977  ;;  %v1169_v24 = vpop.permute.xlu0 %1168 }
 0x32e   : > { %v979_v38 = vsel %vm467_vm0, %v976_v32, %v978_v37  ;;  %v980_v39 = vsel %vm467_vm0, %v978_v37, %v976_v32  ;;  %v919_v32 = vld [vmem:[%s1930_s5] sm:$0xf]  ;;  %v1212_v37 = vrot.slane %v1465_v29, %v1679_v6 }
 0x32f   : > { %v993_v40 = vmul.f32 %v986_v35, %v979_v38  ;;  %v994_v41 = vmul.f32 %v990_v36, %v980_v39  ;;  %v1208_v36 = vrot.slane %v1465_v29, %v1677_v5 }
 0x331   : > { %v1510_v43 = vpack.c.bf16 %v993_v40, %v993_v40  ;;  %v1511_v44 = vpack.c.bf16 %v994_v41, %v994_v41  ;;  %v833_v45 = vpop.permute.xlu1 %832 }
 0x333   : > { %1453 = vmatprep.subr.msk.bf16.mxu1 %vm518_vm4, %v1511_v44  ;;  %v1028_v46 = vsel %vm518_vm4, %v1510_v43, 0 }
 0x334   : > { %1036 = vmatpush1.bf16.msra.mxu1 %v1028_v46 }
 0x335   : > { %v835_v50 = vpop.permute.xlu1 %834 }
 0x336   : > { %v836_v57 = vsel %vm315_vm2, %v833_v45, %v835_v50  ;;  %v837_v58 = vsel %vm315_vm2, %v835_v50, %v833_v45  ;;  %v1467_v50 = vld [vmem:[%s1930_s5 + $0x8] sm:$0xf] }
 0x337   : > { %1454 = vmatmul.mubr.msk.bf16.vlgmr.msra.gmra.mrb[0].mxu1 %vm514_vm6, %v1448_v49  ;;  %v850_v3 = vmul.f32 %v843_v52, %v837_v58  ;;  %v851_v4 = vmul.f32 %v847_v53, %v836_v57  ;;  %v1324_v58 = vld [vmem:[%s1932_s7] sm:$0xff] }
 0x338   : > { %1130 = vmatprep.mubr.bf16.mxu1 %v1569_v2 }
 0x339   : > { %v864_v59 = vpop.permute.xlu1 %863 }
 0x33a   : > { %v865_v60 = vsel %vm345_vm3, %v862_v42, %v864_v59  ;;  %v866_v61 = vsel %vm345_vm3, %v864_v59, %v862_v42  ;;  %v1198_v42 = vpop.permute.xlu0 %1197 }
 0x33b   : > { %v879_v8 = vmul.f32 %v872_v54, %v866_v61  ;;  %v880_v9 = vmul.f32 %v876_v55, %v865_v60 }
 0x33d   : > { %v1512_v11 = vpack.c.bf16 %v879_v8, %v850_v3  ;;  %v893_v12 = vpop.permute.xlu1 %892  ;;  %v1513_v13 = vpack.c.bf16 %v880_v9, %v851_v4 }
 0x33e   : > { %v894_v14 = vsel %vm376_vm5, %v891_v51, %v893_v12  ;;  %v895_v15 = vsel %vm376_vm5, %v893_v12, %v891_v51 }
 0x33f   : > { %v908_v16 = vmul.f32 %v901_v62, %v895_v15  ;;  %v909_v17 = vmul.f32 %v905_v63, %v894_v14  ;;  %1098 = vmatprep.subr.bf16.mxu1 %v1513_v13 }
 0x340   : > { %1099 = vmatpush1.bf16.msra.mxu1 %v1512_v11  ;;  %v1313_v11 = vld [vmem:[%s1931_s6] sm:$0xff] }
 0x341   : > { %v1514_v20 = vpack.c.bf16 %v908_v16, %v908_v16  ;;  %v1515_v21 = vpack.c.bf16 %v909_v17, %v909_v17  ;;  %v1142_v22 = vpop.permute.xlu1 %1141 }
 0x342   : > { %v1143_v30 = vsel %vm635_vm7, %v1140_v10, %v1142_v22  ;;  %v1144_v31 = vsel %vm635_vm7, %v1142_v22, %v1140_v10 }
 0x343   : > { %1459 = vmatprep.subr.msk.bf16.mxu1 %vm518_vm4, %v1515_v21  ;;  %v1093_v26 = vsel %vm518_vm4, %v1514_v20, 0  ;;  %v1157_v38 = vmul.f32 %v1150_v23, %v1143_v30  ;;  %v1158_v39 = vmul.f32 %v1154_v25, %v1144_v31 }
 0x344   : > { %1101 = vmatpush1.bf16.msra.mxu1 %v1093_v26 }
 0x345   : > { %v1171_v33 = vpop.permute.xlu1 %1170 }
 0x346   : > { %v1172_v34 = vsel %vm666_vm8, %v1169_v24, %v1171_v33  ;;  %v1173_v35 = vsel %vm666_vm8, %v1171_v33, %v1169_v24 }
 0x347   : > { %v1186_v40 = vmul.f32 %v1179_v27, %v1172_v34  ;;  %v1187_v41 = vmul.f32 %v1183_v28, %v1173_v35  ;;  %1460 = vmatmul.mubr.msk.bf16.vlgmr.msra.gmra.mrb[0].mxu1 %vm514_vm6, %v919_v32 }
 0x348   : > { %1287 = vmatprep.mubr.bf16.mxu1 %v1569_v2 }
 0x349   : > { %v1516_v43 = vpack.c.bf16 %v1186_v40, %v1157_v38  ;;  %v1200_v44 = vpop.permute.xlu1 %1199  ;;  %v1517_v45 = vpack.c.bf16 %v1187_v41, %v1158_v39 }
 0x34a   : > { %v1201_v46 = vsel %vm697_vm9, %v1198_v42, %v1200_v44  ;;  %v1202_v5 = vsel %vm697_vm9, %v1200_v44, %v1198_v42 }
 0x34b   : > { %v1215_v47 = vmul.f32 %v1208_v36, %v1201_v46  ;;  %v1216_v6 = vmul.f32 %v1212_v37, %v1202_v5  ;;  %1255 = vmatprep.subr.bf16.mxu1 %v1517_v45 }
 0x34c   : > { %1256 = vmatpush1.bf16.msra.mxu1 %v1516_v43 }
 0x34d   : > { %v1518_v48 = vpack.c.bf16 %v1215_v47, %v1215_v47  ;;  %v1519_v49 = vpack.c.bf16 %v1216_v6, %v1216_v6 }
 0x34f   : > { %1472 = vmatprep.subr.msk.bf16.mxu1 %vm518_vm4, %v1519_v49  ;;  %v1250_v2 = vsel %vm518_vm4, %v1518_v48, 0 }
 0x350   : > { %1258 = vmatpush1.bf16.msra.mxu1 %v1250_v2 }
 0x353   : > { %1473 = vmatmul.mubr.msk.bf16.vlgmr.msra.gmra.mrb[0].mxu1 %vm514_vm6, %v1467_v50 }
 0x426   : > { %v1289_v51 = vpop.f32.mrb[0].mxu1 }
 0x427   : > { %v1291_v7 = vpop.f32.mrb[1].mxu1  ;;  %v1301_v52 = vmul.f32 %v1289_v51, %v1289_v51 }
 0x428   : > { %v1293_v53 = vpop.f32.mrb[2].mxu1  ;;  %v1298_v54 = vadd.f32 %v1291_v7, %v1289_v51  ;;  %v1302_v55 = vmul.f32 %v1291_v7, %v1291_v7 }
 0x429   : > { %v1294_v56 = vpop.f32.mrb[3].mxu1 }
 0x42a   : > { %1299 = vadd.xlane.f32.xlu0 %v1298_v54  ;;  %v1303_v57 = vadd.f32 %v1302_v55, %v1301_v52 }
 0x42c   : > { %1304 = vadd.xlane.f32.xlu1 %v1303_v57 }
 0x43d   : > { %1327 = vperm.xlu1 %1554, %v1324_v58  }
 0x4b7   : > { %v1300_v59 = vpop.xlane.xlu0 %1299 }
 0x4b8   : > { %v1306_v60 = vmul.f32 0.00390625, %v1300_v59 }
 0x4b9   : > { %v1305_v61 = vpop.xlane.xlu1 %1304 }
 0x4ba   : > { %v1307_v62 = vmul.f32 0.00390625, %v1305_v61  ;;  %v1308_v63 = vmul.f32 %v1306_v60, %v1306_v60  ;;  %v1315_v3 = vsub.f32 %v1289_v51, %v1306_v60  ;;  %v1316_v4 = vsub.f32 %v1291_v7, %v1306_v60 }
 0x4bc   : > { %v1309_v8 = vsub.f32 %v1307_v62, %v1308_v63 }
 0x4bd   : > { %v1328_v17 = vpop.permute.xlu1 %1327 }
 0x4be   : > { %v1310_v9 = vmax.f32 %v1309_v8, 0.0 }
 0x4c0   : > { %v1311_v10 = vadd.f32 1e-05, %v1310_v9 }
 0x4c2   : > { %1557 = vrsqrt.f32 %v1311_v10 }
 0x4cc   : > { %v1558_v12 = vpop.eup %1557 }
 0x4cd   : > { %v1314_v13 = vmul.f32 %v1558_v12, %v1313_v11 }
 0x4cf   : > { %1319 = vperm.xlu0 %1553, %v1314_v13  }
 0x54e   : > { %v1320_v14 = vpop.permute.xlu0 %1319 }
 0x54f   : > { %v1322_v15 = vmul.f32 %v1320_v14, %v1315_v3  ;;  %v1323_v16 = vmul.f32 %v1320_v14, %v1316_v4 }
 0x551   : > { %v1330_v18 = vadd.f32 %v1328_v17, %v1322_v15  ;;  %v1331_v19 = vadd.f32 %v1328_v17, %v1323_v16 }
 0x553   : > { %v1332_v20 = vadd.f32 %v1330_v18, %v1637_v0  ;;  %v1333_v21 = vadd.f32 %v1331_v19, %v1643_v1 }
 0x555   : > { %1334 = vst [vmem:[%s305_s9] sm:$0xff] %v1332_v20  ;;  %1335 = vst [vmem:[%s305_s9 + $0x8] sm:$0xff] %v1333_v21 }
 0x556 PF: > { %s18_s27 = sadd.s32 1, %s1565_s27  }
 0x557   : > { %p15_p4 = scmp.ge.s32.totalorder %s18_s27, 4  }
 0x559   :  { %17 = sbr.rel (!%p15_p4) target bundleno = 1 (0x1), region = 95 }

</bundles_post_ra>
